<compile_context>
chip_gen: v5e
topology: v5e:2x2
jax: 0.10.0
libtpu: 0.0.40
codegen_flags: <defaults>
</compile_context>

<pallas_src>
import jax
import jax.numpy as jnp
from jax.experimental import pallas as pl
from jax.experimental.pallas import tpu as pltpu


def _sig_t_kernel(x_ref, wt_ref, g_ref, gt_ref, o_ref):
    # x_ref:  (TB, Din)       packed input batch tile
    # wt_ref: (Din, Dout)     pre-transposed (block-diagonal) weight, VMEM-resident
    # g_ref:  (Dout, Din)     0/1 group-sum matrix, resident
    # gt_ref: (Din, Dout)     its transpose, resident
    # o_ref:  (TB, Dout)      lane-dense output tile
    x = x_ref[...]
    # Single MXU matmul: (TB, Din) @ (Din, Dout) -> (TB, Dout)
    y = jnp.dot(x, wt_ref[...], preferred_element_type=jnp.float32)
    # clamp(1e-5, 1 - 1e-5)
    y = jnp.clip(y, 1e-5, 1.0 - 1e-5)
    # L1 row-sums per class-row group on the MXU (y > 0 post-clamp: no abs needed).
    denom = jnp.dot(y, g_ref[...], preferred_element_type=jnp.float32)   # (TB, Din)
    # denom >= C*1e-5 >> 1e-12, so F.normalize's eps clamp is a no-op (dropped).
    r = pl.reciprocal(denom, approx=True)
    r = r * (2.0 - denom * r)          # one Newton step -> full f32 precision
    # Broadcast 1/denom back to (TB, Dout) via the transposed grouping matrix.
    inv_full = jnp.dot(r, gt_ref[...], preferred_element_type=jnp.float32)
    o_ref[...] = y * inv_full


def make_sig_t_weight(num_classes: int) -> jnp.ndarray:
    """Deterministic weight matching sig_t.__init__: (C*C, C)."""
    C = num_classes
    w = jnp.full((C * C, C), 0.1 / C, dtype=jnp.float32)
    # Row i of block i gets an extra 0.9 (temp[i].add_(ones - 0.1)).
    diag_rows = jnp.arange(C) * (C + 1)
    w = w.at[diag_rows, :].add(0.9)
    return w


def _vmem_limit_bytes() -> int:
    """Per-generation scoped-VMEM budget (~70% of physical, capped at 96 MiB)."""
    cap = 64 << 20          # conservative fallback = v7x per-TC physical VMEM
    try:
        info = pltpu.get_tpu_info()
        cap = int(getattr(info, "vmem_capacity_bytes", cap))
    except Exception:
        pass
    # v5e/v6e (128 MiB physical) -> ~89 MiB; v7x (64 MiB physical) -> ~44 MiB.
    return int(min(96 << 20, (cap * 7) // 10))


def _choose_tile_rows(R: int, d_in: int, d_out: int, vmem_limit_bytes: int) -> int:
    """Largest batch tile (rows of the packed layout) that fits the VMEM budget."""
    resident = 3 * 4 * d_in * d_out           # W^T, G, G^T, single-buffered
    per_row = 4 * 2 * (d_in + d_out)          # double-buffered x + out blocks, f32
    budget = vmem_limit_bytes - resident - (2 << 20)   # headroom for compiler scratch
    tb_max = budget // per_row if budget > 0 else 8
    tb = int(max(8, min(tb_max, 2048)))       # measured sweet spot: 512-2048 rows
    tb = max(8, (tb // 8) * 8)                # sublane multiple
    # Guarantee multiple grid steps: DMA/compute overlap + v7x 2-TC sharding.
    target_steps = 4 if R >= 32 else 2
    while tb > 8 and pl.cdiv(max(R, 1), tb) < target_steps:
        tb = max(8, ((tb // 2) // 8) * 8)
    return tb


def sig_t_forward(x: jnp.ndarray, w: jnp.ndarray, num_classes: int) -> jnp.ndarray:
    B = x.shape[0]
    C = num_classes
    x2d = x.reshape(B, -1).astype(jnp.float32)          # x.view(B, -1)
    assert x2d.shape[1] == C

    # Lane packing for small C: fold k batch rows into the lane dim so the output
    # slab is >= 128 lanes wide (unmasked stores). k = 1 leaves the layout as-is.
    k = max(1, -(-128 // (C * C))) if C * C < 128 else 1
    d_in, d_out = k * C, k * C * C

    # Host/XLA-side (one-time) layout prep: transposed weight + grouping matrices.
    w_t = jnp.asarray(w, jnp.float32).T                            # (C, C*C)
    g = jnp.repeat(jnp.eye(C, dtype=jnp.float32), C, axis=0)       # (C*C, C)
    if k > 1:
        eye_k = jnp.eye(k, dtype=jnp.float32)
        w_t = jnp.kron(eye_k, w_t)                                 # (d_in, d_out)
        g = jnp.kron(eye_k, g)                                     # (d_out, d_in)
    g_t = g.T                                                      # (d_in, d_out)

    vmem_limit = _vmem_limit_bytes()
    R = pl.cdiv(B, k)                       # rows of the packed layout
    tb = _choose_tile_rows(R, d_in, d_out, vmem_limit)
    steps = max(2, pl.cdiv(R, tb))          # never collapse the grid to one step
    r_pad = steps * tb
    b_pad = r_pad * k

    # Pad the batch explicitly (zero rows are benign: clamp -> 1e-5, denom = C*1e-5),
    # then fold k rows into the lane dim (free row-major view).
    x_pad = jnp.pad(x2d, ((0, b_pad - B), (0, 0)))
    x_packed = x_pad.reshape(r_pad, d_in)

    out_packed = pl.pallas_call(
        _sig_t_kernel,
        out_shape=jax.ShapeDtypeStruct((r_pad, d_out), jnp.float32),
        grid=(steps,),
        in_specs=[
            pl.BlockSpec((tb, d_in), lambda b: (b, 0)),                       # x tile
            pl.BlockSpec((d_in, d_out), lambda b: (0, 0),
                         pipeline_mode=pl.Buffered(1)),                       # W^T
            pl.BlockSpec((d_out, d_in), lambda b: (0, 0),
                         pipeline_mode=pl.Buffered(1)),                       # G
            pl.BlockSpec((d_in, d_out), lambda b: (0, 0),
                         pipeline_mode=pl.Buffered(1)),                       # G^T
        ],
        out_specs=pl.BlockSpec((tb, d_out), lambda b: (b, 0)),
        compiler_params=pltpu.CompilerParams(
            dimension_semantics=("parallel",),
            vmem_limit_bytes=vmem_limit,
        ),
        cost_estimate=pl.CostEstimate(
            flops=6 * r_pad * d_in * d_out,
            transcendentals=r_pad * d_in,
            bytes_accessed=4 * (r_pad * d_in + 3 * d_in * d_out + r_pad * d_out),
        ),
    )(x_packed, w_t, g, g_t)

    # Free row-major views: (r_pad, k*C*C) -> (b_pad, C*C) -> slice -> (B, C, C).
    out2d = out_packed.reshape(b_pad, C * C)[:B]
    return out2d.reshape(B, C, C)


def sig_t_reference(x: jnp.ndarray, w: jnp.ndarray, num_classes: int) -> jnp.ndarray:
    """Pure-JAX reference of the PyTorch forward (for correctness checking)."""
    B = x.shape[0]
    C = num_classes
    out = x.reshape(B, -1).astype(jnp.float32) @ w.T          # (B, C*C)
    out = out.reshape(B, C, C)
    out = jnp.clip(out, 1e-5, 1.0 - 1e-5)
    denom = jnp.maximum(jnp.sum(jnp.abs(out), axis=2, keepdims=True), 1e-12)
    return out / denom


if __name__ == "__main__":
    B = 2
    num_classes = 4

    key = jax.random.PRNGKey(0)
    # x plays the role of class-posterior-like features of size num_classes.
    x = jax.random.uniform(key, (B, num_classes), dtype=jnp.float32)
    w = make_sig_t_weight(num_classes)

    out = sig_t_forward(x, w, num_classes)
    out = jax.block_until_ready(out)

    ref = sig_t_reference(x, w, num_classes)
    assert out.shape == (B, num_classes, num_classes)
    assert jnp.allclose(out, ref, atol=1e-5, rtol=1e-5)

    print("KERNEL_OK")
</pallas_src>

<mosaic_0001>
module attributes {stable_mosaic.version = 11 : i64} {
  func.func @_sig_t_kernel(%arg0: i32, %arg1: memref<8x32xf32, #tpu.memory_space<vmem>>, %arg2: memref<32x128xf32, #tpu.memory_space<vmem>>, %arg3: memref<128x32xf32, #tpu.memory_space<vmem>>, %arg4: memref<32x128xf32, #tpu.memory_space<vmem>>, %arg5: memref<8x128xf32, #tpu.memory_space<vmem>>) attributes {dimension_semantics = [#tpu.dimension_semantics<parallel>], iteration_bounds = array<i64: 2>, scalar_prefetch = 0 : i64, scratch_operands = 0 : i64, tpu.core_type = #tpu.core_type<tc>, window_params = [{transform_indices = @transform_0, window_bounds = array<i64: 8, 32>}, {pipeline_mode = #tpu.pipeline_mode<synchronous>, transform_indices = @transform_1, window_bounds = array<i64: 32, 128>}, {pipeline_mode = #tpu.pipeline_mode<synchronous>, transform_indices = @transform_2, window_bounds = array<i64: 128, 32>}, {pipeline_mode = #tpu.pipeline_mode<synchronous>, transform_indices = @transform_3, window_bounds = array<i64: 32, 128>}, {transform_indices = @transform_4, window_bounds = array<i64: 8, 128>}]} {
    %c0 = arith.constant 0 : index
    %c0_0 = arith.constant 0 : index
    %0 = vector.load %arg1[%c0, %c0_0] : memref<8x32xf32, #tpu.memory_space<vmem>>, vector<8x32xf32>
    %c0_1 = arith.constant 0 : index
    %c0_2 = arith.constant 0 : index
    %1 = vector.load %arg2[%c0_1, %c0_2] : memref<32x128xf32, #tpu.memory_space<vmem>>, vector<32x128xf32>
    %cst = arith.constant dense<0.000000e+00> : vector<8x128xf32>
    %2 = tpu.matmul %0, %1, %cst {dimension_numbers = #tpu.dot_dimension_numbers<[1], [0], [0], [1], [0, 0, 1, 1], [], []>} : vector<8x32xf32>, vector<32x128xf32>, vector<8x128xf32> -> vector<8x128xf32>
    %cst_3 = arith.constant 9.99999974E-6 : f32
    %cst_4 = arith.constant 0.999989986 : f32
    %3 = vector.broadcast %cst_3 : f32 to vector<8x128xf32>
    %4 = arith.maximumf %3, %2 : vector<8x128xf32>
    %5 = vector.broadcast %cst_4 : f32 to vector<8x128xf32>
    %6 = arith.minimumf %5, %4 : vector<8x128xf32>
    %c0_5 = arith.constant 0 : index
    %c0_6 = arith.constant 0 : index
    %7 = vector.load %arg3[%c0_5, %c0_6] : memref<128x32xf32, #tpu.memory_space<vmem>>, vector<128x32xf32>
    %cst_7 = arith.constant dense<0.000000e+00> : vector<8x32xf32>
    %8 = tpu.matmul %6, %7, %cst_7 {dimension_numbers = #tpu.dot_dimension_numbers<[1], [0], [0], [1], [0, 0, 1, 1], [], []>} : vector<8x128xf32>, vector<128x32xf32>, vector<8x32xf32> -> vector<8x32xf32>
    %9 = tpu.reciprocal %8 {approx = true} : vector<8x32xf32> -> vector<8x32xf32>
    %10 = arith.mulf %8, %9 : vector<8x32xf32>
    %cst_8 = arith.constant 2.000000e+00 : f32
    %11 = vector.broadcast %cst_8 : f32 to vector<8x32xf32>
    %12 = arith.subf %11, %10 : vector<8x32xf32>
    %13 = arith.mulf %9, %12 : vector<8x32xf32>
    %c0_9 = arith.constant 0 : index
    %c0_10 = arith.constant 0 : index
    %14 = vector.load %arg4[%c0_9, %c0_10] : memref<32x128xf32, #tpu.memory_space<vmem>>, vector<32x128xf32>
    %cst_11 = arith.constant dense<0.000000e+00> : vector<8x128xf32>
    %15 = tpu.matmul %13, %14, %cst_11 {dimension_numbers = #tpu.dot_dimension_numbers<[1], [0], [0], [1], [0, 0, 1, 1], [], []>} : vector<8x32xf32>, vector<32x128xf32>, vector<8x128xf32> -> vector<8x128xf32>
    %16 = arith.mulf %6, %15 : vector<8x128xf32>
    %c0_12 = arith.constant 0 : index
    %c0_13 = arith.constant 0 : index
    %17 = vector.load %arg5[%c0_12, %c0_13] : memref<8x128xf32, #tpu.memory_space<vmem>>, vector<8x128xf32>
    tpu.vector_store %arg5[%c0_12, %c0_13], %16 {strides = array<i32>} : memref<8x128xf32, #tpu.memory_space<vmem>>, vector<8x128xf32>,
    return
  }
  func.func @transform_0(%arg0: i32) -> (i32, i32) {
    %c0_i32 = arith.constant 0 : i32
    %c0_i32_0 = arith.constant 0 : i32
    return %arg0, %c0_i32 : i32, i32
  }
  func.func @transform_1(%arg0: i32) -> (i32, i32) {
    %c0_i32 = arith.constant 0 : i32
    %c0_i32_0 = arith.constant 0 : i32
    %c0_i32_1 = arith.constant 0 : i32
    return %c0_i32, %c0_i32_0 : i32, i32
  }
  func.func @transform_2(%arg0: i32) -> (i32, i32) {
    %c0_i32 = arith.constant 0 : i32
    %c0_i32_0 = arith.constant 0 : i32
    %c0_i32_1 = arith.constant 0 : i32
    return %c0_i32, %c0_i32_0 : i32, i32
  }
  func.func @transform_3(%arg0: i32) -> (i32, i32) {
    %c0_i32 = arith.constant 0 : i32
    %c0_i32_0 = arith.constant 0 : i32
    %c0_i32_1 = arith.constant 0 : i32
    return %c0_i32, %c0_i32_0 : i32, i32
  }
  func.func @transform_4(%arg0: i32) -> (i32, i32) {
    %c0_i32 = arith.constant 0 : i32
    %c0_i32_0 = arith.constant 0 : i32
    return %arg0, %c0_i32 : i32, i32
  }
}

</mosaic_0001>

<bundles_post_ra>
// kernel: tpu_custom_call.1
= control target key start
LH: loop header
LB: loop body
LE: loop exit
PB: predicated region body
PF: predicated region fallthrough
CT: control target
= control target key end

     0   :  { %9 = vsyncpa [#allocation3], 0  ;;  %s669_s0 = inlined_call_operand.vmem [shape: f32[16,32], index: 0, kind: input, shape index: {}]   ;;  %s670_s1 = inlined_call_operand.vmem [shape: f32[32,128], index: 1, kind: input, shape index: {}]   ;;  %s671_s2 = inlined_call_operand.vmem [shape: f32[128,32], index: 2, kind: input, shape index: {}]   ;;  %s672_s3 = inlined_call_operand.vmem [shape: f32[32,128], index: 3, kind: input, shape index: {}]   ;;  %s673_s4 = inlined_call_operand.hbm [shape: f32[16,128], index: 4, kind: output, shape index: {}]  }
   0x1   :  { %11 = vsyncpa [#allocation3 + $0x1], 0  ;;  %s510_s15 = smov 0   ;;  %s512_s16 = smov 0  }
   0x2   :  { %s514_s17 = smov 0   ;;  %s516_s18 = smov 0  }
   0x3 LB: > { %s531_s19 = sadd.s32 4294967295, %s483_s18   ;;  %s368_s20 = sadd.s32 4294967294, %s483_s18   ;;  %s483_s18 = sphi %s516_s18, %s679_s18   ;;  %s479_s17 = sphi %s514_s17, %s678_s17   ;;  %s475_s16 = sphi %s512_s16, %s677_s16   ;;  %s471_s15 = sphi %s510_s15, %s676_s15  }
   0x4   : > { %s535_s21 = sadd.s32 1, %s483_s18   ;;  %s113_s22 = sadd.s32 1, %s479_s17 }
   0x5   : > { %s110_s23 = ssub.s32 %s483_s18, %s535_s21  ;;  %p123_p0 = scmp.ne.s32.totalorder %s479_s17, %s475_s16 }
   0x6   : > { %p111_p1 = scmp.eq.s32.totalorder %s110_s23, 0  ;;  %p124_p2 = scmp.eq.s32.totalorder %s531_s19, 1 }
   0x7   : > { %p129_p3 = scmp.ne.s32.totalorder %s475_s16, %s471_s15  ;;  %p130_p4 = scmp.eq.s32.totalorder %s368_s20, 1 }
   0x8   : > { %s546_s24 = scalar_select %p111_p1, %s479_s17, %s113_s22  }
   0x9   : > { %p548_p5 = por %p124_p2, %p123_p0  ;;  %p552_p6 = por %p130_p4, %p129_p3 }
   0xa   : > { %p371_p7 = scmp.ge.s32.totalorder %s483_s18, 1  ;;  %p164_p8 = scmp.lt.s32.totalorder %s483_s18, 3 }
   0xc   : > { %p165_p9 = pnand %p371_p7, %p164_p8 }
   0xd   : > { %p189_p10 = scmp.lt.s32.totalorder (!%p165_p9), %s531_s19, 1  ;;  %s186_s29 = sand.u32 (!%p165_p9), 1, %s475_s16  }
   0xe   : > { %168 = sbr.rel (%p165_p9) target bundleno = 433 (0x1b1), region = 36  ;;  %s372_s30 = sshll.u32 (!%p165_p9), %s186_s29, 3 }
   0xf   : > { %s377_s5 = sshll.u32 (!%p165_p9), %s531_s19, 3  ;;  %s188_s9 = scalar_lea.vmem (!%p165_p9), [#allocation2], %s372_s30 }
  0x10   : > { %s304_s8 = scalar_lea.hbm (!%p165_p9), %s673_s4, %s377_s5  ;;  %s306_s10 = sshll.u32 (!%p165_p9), %s188_s9, 4  ;;  %s307_s10 = int_to_ptr.vmem [resolvable:$true] %s306_s10 }
  0x11   : > { %s294_s12 = scalar_lea.sflag (!%p165_p9), [#allocation3], %s186_s29 }
  0x13   : > { %v197_v0 = vld [vmem:[%s670_s1 + $0x18] sm:$0xff]  ;;  %v196_v1 = vld [vmem:[%s670_s1 + $0x10] sm:$0xff]  ;;  %v195_v4 = vld [vmem:[%s670_s1 + $0x8] sm:$0xff]  ;;  %s190_s11 = scalar_select %p189_p10, %s531_s19, 1  ;;  %vm198_vm0 = vcmask 261120  }
  0x14   : > { %214 = vmatpush.msra.mxu0 %v197_v0  ;;  %v239_v2 = vld [vmem:[%s671_s2 + $0x78] sm:$0xff]  ;;  %v238_v3 = vld [vmem:[%s671_s2 + $0x70] sm:$0xff]  ;;  %v237_v5 = vld [vmem:[%s671_s2 + $0x68] sm:$0xff] }
  0x15   : > { %240 = vmatpush.msra.mxu1 %v239_v2  ;;  %v194_v6 = vld [vmem:[%s670_s1] sm:$0xff]  ;;  %s373_s22 = sshll.u32 %s190_s11, 3  ;;  %v235_v9 = vld [vmem:[%s671_s2 + $0x58] sm:$0xff]  ;;  %v234_v10 = vld [vmem:[%s671_s2 + $0x50] sm:$0xff]  ;;  %s308_s11 = sshll.u32 %s304_s8, 4  ;;  %s309_s11 = int_to_ptr.hbm [resolvable:$true] %s308_s11 }
  0x16   : > { %215 = vmatpush.msra.mxu0 %v196_v1  ;;  %s192_s28 = scalar_lea.vmem %s669_s0, %s373_s22  ;;  %v236_v7 = vld [vmem:[%s671_s2 + $0x60] sm:$0xff]  ;;  %v233_v11 = vld [vmem:[%s671_s2 + $0x48] sm:$0xff]  ;;  %v231_v13 = vld [vmem:[%s671_s2 + $0x38] sm:$0xff]  ;;  %s435_s13 = sshra.s32 %s309_s11, 4  ;;  %s436_s13 = int_to_ptr.hbm [resolvable:$true] %s435_s13 }
  0x17   : > { %241 = vmatpush.msra.mxu1 %v238_v3  ;;  %v193_v8 = vld [vmem:[%s192_s28] sm:$0xff]  ;;  %v230_v14 = vld [vmem:[%s671_s2 + $0x30] sm:$0xff]  ;;  %v229_v15 = vld [vmem:[%s671_s2 + $0x28] sm:$0xff]  ;;  %s437_s14 = scalar_lea.hbm %s436_s13, 8  ;;  %s441_s22 = scalar_lea.hbm %s673_s4, 16 }
  0x18   : > { %216 = vmatpush.msra.mxu0 %v195_v4  ;;  %v232_v12 = vld [vmem:[%s671_s2 + $0x40] sm:$0xff]  ;;  %v227_v17 = vld [vmem:[%s671_s2 + $0x18] sm:$0xff]  ;;  %v226_v18 = vld [vmem:[%s671_s2 + $0x10] sm:$0xff]  ;;  %p438_p11 = scmp.ne.s32.totalorder %s436_s13, %s437_s14  ;;  %p442_p0 = scmp.lt.s32.totalorder %s436_s13, %s673_s4 }
  0x19   : > { %242 = vmatpush.msra.mxu1 %v237_v5  ;;  %v228_v16 = vld [vmem:[%s671_s2 + $0x20] sm:$0xff]  ;;  %v225_v19 = vld [vmem:[%s671_s2 + $0x8] sm:$0xff]  ;;  %v267_v24 = vld [vmem:[%s672_s3 + $0x18] sm:$0xff]  ;;  %p443_p1 = scmp.lt.s32.totalorder %s441_s22, %s437_s14 }
  0x1a   : > { %217 = vmatpush.msra.mxu0 %v194_v6  ;;  %v224_v20 = vld [vmem:[%s671_s2] sm:$0xff]  ;;  %283 = vmatpush.msra.mxu2 %v267_v24  ;;  %v266_v25 = vld [vmem:[%s672_s3 + $0x10] sm:$0xff]  ;;  %v265_v26 = vld [vmem:[%s672_s3 + $0x8] sm:$0xff]  ;;  %p439_p12 = pnand %p438_p11, %p548_p5 }
  0x1b   : > { %374 = vmatmul.msk.f32.vlgmr.msra.gmra.mxu0 %vm198_vm0, %v193_v8  ;;  %243 = vmatpush.msra.mxu1 %v236_v7  ;;  %v264_v27 = vld [vmem:[%s672_s3] sm:$0xff]  ;;  %p444_p2 = por %p443_p1, %p442_p0 }
  0x1c   : > { %284 = vmatpush.msra.mxu2 %v266_v25  ;;  %p440_p13 = pneg %p439_p12 }
  0x1d   : > { %244 = vmatpush.msra.mxu1 %v235_v9 }
  0x1e   : > { %285 = vmatpush.msra.mxu2 %v265_v26  ;;  %p445_p3 = pnand %p444_p2, %p440_p13 }
  0x1f   : > { %245 = vmatpush.msra.mxu1 %v234_v10 }
  0x20   : > { %286 = vmatpush.msra.mxu2 %v264_v27 }
  0x21   : > { %246 = vmatpush.msra.mxu1 %v233_v11 }
  0x23   : > { %247 = vmatpush.msra.mxu1 %v232_v12 }
  0x25   : > { %248 = vmatpush.msra.mxu1 %v231_v13 }
  0x27   : > { %249 = vmatpush.msra.mxu1 %v230_v14 }
  0x29   : > { %250 = vmatpush.msra.mxu1 %v229_v15 }
  0x2b   : > { %251 = vmatpush.msra.mxu1 %v228_v16 }
  0x2d   : > { %252 = vmatpush.msra.mxu1 %v227_v17 }
  0x2f   : > { %253 = vmatpush.msra.mxu1 %v226_v18 }
  0x31   : > { %254 = vmatpush.msra.mxu1 %v225_v19 }
  0x33   : > { %255 = vmatpush.msra.mxu1 %v224_v20 }
  0x98   : > { %v219_v21 = vpop.f32.mrf.mxu0 }
  0x99   : > { %v222_v22 = vmax.f32 %v219_v21, 1e-05 }
  0x9b   : > { %v223_v23 = vmin.f32 %v222_v22, 0.99999 }
  0x9d   : > { %256 = vmatmul.f32.vlgmr.msra.gmra.mxu1 %v223_v23 }
 0x11a   : > { %v257_v28 = vpop.f32.mrf.mxu1 }
 0x11b   : > { %419 = vrcp.f32 %v257_v28 }
 0x121   : > { %v420_v29 = vpop.eup %419 }
 0x122   : > { %v261_v30 = vmul.f32 %v420_v29, %v257_v28 }
 0x124   : > { %v262_v31 = vsub.f32 2.0, %v261_v30 }
 0x126   : > { %v263_v32 = vmul.f32 %v420_v29, %v262_v31 }
 0x128   : > { %375 = vmatmul.msk.f32.vlgmr.msra.gmra.mxu2 %vm198_vm0, %v263_v32 }
 0x1ab   : > { %v288_v33 = vpop.f32.mrf.mxu2 }
 0x1ac   : > { %v291_v34 = vmul.f32 %v288_v33, %v223_v23 }
 0x1ae   : > { %292 = vst [vmem:[%s188_s9] sm:$0xff] %v291_v34 }
 0x1af   : > { %448 = shalt.err (!%p445_p3)
}
 0x1b0   : > { %380 = dma.vmem_to_hbm [thread:$0]  (%p548_p5), %s307_s10, 128, %s309_s11, %s294_s12  }
 0x1b1 PF: > { %p386_p4 = scmp.ge.s32.totalorder %s483_s18, 2  ;;  %s320_s28 = sand.u32 1, %s471_s15  }
 0x1b2   : > { %s321_s29 = scalar_lea.sflag [#allocation3], %s320_s28 }
 0x1b3   : > { %p383_p7 = pnand %p386_p4, %p552_p6 }
 0x1b5   : > { %p384_p8 = pneg %p383_p7 }
 0x1b7   : > { %466 = dma.done.wait (%p384_p8), %s321_s29, 128  }
 0x1b8   : > { %468 = vsyncadd (%p384_p8), %s321_s29, 4294967168  ;;  %p14_p9 = scmp.ge.s32.totalorder %s535_s21, 4   ;;  %s676_s15 = smov %s475_s16 }
 0x1b9   : > { %s677_s16 = smov %s479_s17  ;;  %s678_s17 = smov %s546_s24 }
 0x1ba   : > { %s679_s18 = smov %s535_s21  ;;  %16 = sbr.rel (!%p14_p9) target bundleno = 3 (0x3), region = 71 }
 0x1bf   :  { %327 = vsyncpa [#allocation3], 1 }
 0x1c0   :  { %329 = vsyncpa [#allocation3 + $0x1], 1 }

</bundles_post_ra>
